<compile_context>
chip_gen: v5e
topology: v5e:2x2
jax: 0.10.0
libtpu: 0.0.40
codegen_flags: <defaults>
</compile_context>

<pallas_src>
import jax
import jax.numpy as jnp
from jax.experimental import pallas as pl
from jax.experimental.pallas import tpu as pltpu

C_IN = 32      # channels (c_in)
SEQ_LEN = 16   # input length L
BATCH = 2
KERNEL = 3
PAD = 2        # Conv1d(padding=2, padding_mode='circular')
BN_EPS = 1e-5


def _conv_layer_kernel(xp_ref, w_ref, b_ref, gamma_ref, beta_ref, o_ref):
    # xp_ref:    (B, L+2*PAD, C)  circularly padded input, feature-last
    # w_ref:     (K, C, C)        conv taps, w[k] is (in_ch, out_ch)
    # b_ref:     (1, C)           conv bias
    # gamma_ref: (1, C)           BatchNorm weight
    # beta_ref:  (1, C)           BatchNorm bias
    # o_ref:     (B, Lout, C)
    B, Lp, C = xp_ref.shape
    K = w_ref.shape[0]
    Lc = Lp - K + 1            # conv output length (= L + 2 for padding=2, k=3)
    Lout = (Lc - 1) // 2 + 1   # MaxPool1d(k=3, s=2, p=1) output length

    # ---- Conv1d (circular pad already applied) + bias: 3 tap-matmuls on MXU ----
    hs = []
    for bidx in range(B):
        xb = xp_ref[bidx]                              # (Lp, C)
        acc = jnp.zeros((Lc, C), jnp.float32)
        for k in range(K):
            acc = acc + jnp.dot(xb[k:k + Lc, :], w_ref[k],
                                preferred_element_type=jnp.float32)
        hs.append(acc + b_ref[...])                    # (Lc, C)

    # ---- BatchNorm1d, training-mode (biased batch statistics over (B, Lc)) ----
    n = float(B * Lc)
    mean = sum(jnp.sum(h, axis=0, keepdims=True) for h in hs) / n          # (1, C)
    var = sum(jnp.sum((h - mean) ** 2, axis=0, keepdims=True) for h in hs) / n
    scale = jax.lax.rsqrt(var + BN_EPS) * gamma_ref[...]                   # (1, C)
    shift = beta_ref[...]

    # ---- ELU + MaxPool1d(kernel=3, stride=2, padding=1), per batch element ----
    for bidx in range(B):
        hn = (hs[bidx] - mean) * scale + shift
        # ELU(alpha=1); clamp before exp so the unselected branch never overflows.
        a = jnp.where(hn > 0, hn, jnp.exp(jnp.minimum(hn, 0.0)) - 1.0)
        rows = []
        for j in range(Lout):
            # Pooling window j covers padded indices [2j, 2j+2] -> original
            # indices [2j-1, 2j+1]; -inf padding never wins the max, so just
            # clamp the window to valid rows.
            lo = max(2 * j - 1, 0)
            hi = min(2 * j + 1, Lc - 1)
            win = a[lo:lo + 1, :]
            for t in range(lo + 1, hi + 1):
                win = jnp.maximum(win, a[t:t + 1, :])
            rows.append(win)
        o_ref[bidx] = jnp.concatenate(rows, axis=0).astype(o_ref.dtype)


def conv_layer(x, w, b, gamma, beta):
    """x: [B, L, C] -> [B, Lout, C], mirroring ConvLayer.forward.

    BatchNorm uses training-mode batch statistics (a freshly constructed
    nn.Module is in training mode); running-stat buffers are not modeled.
    """
    B, L, C = x.shape
    K = w.shape[0]
    Lc = L + 2 * PAD - K + 1
    Lout = (Lc - 1) // 2 + 1

    # Circular padding along the length axis (PyTorch 'circular' padding_mode:
    # left pad = last PAD rows, right pad = first PAD rows). Pure layout plumbing.
    xp = jnp.concatenate([x[:, L - PAD:, :], x, x[:, :PAD, :]], axis=1)  # [B,L+4,C]

    b2 = b.reshape(1, C)
    g2 = gamma.reshape(1, C)
    be2 = beta.reshape(1, C)

    return pl.pallas_call(
        _conv_layer_kernel,
        out_shape=jax.ShapeDtypeStruct((B, Lout, C), x.dtype),
        grid_spec=pltpu.PrefetchScalarGridSpec(
            num_scalar_prefetch=0,
            grid=(1,),  # whole (tiny) problem in one step: no per-step overhead
            in_specs=[
                pl.BlockSpec((B, L + 2 * PAD, C), lambda i: (0, 0, 0)),  # xp
                pl.BlockSpec((K, C, C), lambda i: (0, 0, 0)),            # conv W
                pl.BlockSpec((1, C), lambda i: (0, 0)),                  # conv b
                pl.BlockSpec((1, C), lambda i: (0, 0)),                  # BN gamma
                pl.BlockSpec((1, C), lambda i: (0, 0)),                  # BN beta
            ],
            out_specs=pl.BlockSpec((B, Lout, C), lambda i: (0, 0, 0)),
        ),
        compiler_params=pltpu.CompilerParams(
            dimension_semantics=("arbitrary",)),
    )(xp, w, b2, g2, be2)


def conv_layer_ref(x, w, b, gamma, beta):
    """Pure-JAX reference implementing the same forward math."""
    B, L, C = x.shape
    K = w.shape[0]
    xp = jnp.concatenate([x[:, L - PAD:, :], x, x[:, :PAD, :]], axis=1)
    Lc = L + 2 * PAD - K + 1
    h = sum(jnp.einsum('blc,cd->bld', xp[:, k:k + Lc, :], w[k]) for k in range(K)) + b
    mean = jnp.mean(h, axis=(0, 1), keepdims=True)
    var = jnp.mean((h - mean) ** 2, axis=(0, 1), keepdims=True)
    hn = (h - mean) * jax.lax.rsqrt(var + BN_EPS) * gamma + beta
    a = jnp.where(hn > 0, hn, jnp.expm1(jnp.minimum(hn, 0.0)))
    neg = jnp.full((B, 1, C), -jnp.inf, a.dtype)
    ap = jnp.concatenate([neg, a, neg], axis=1)
    Lout = (Lc - 1) // 2 + 1
    return jnp.stack(
        [jnp.max(ap[:, 2 * j:2 * j + 3, :], axis=1) for j in range(Lout)], axis=1)


def init_params(key, c_in, kernel_size=KERNEL):
    """Mirror nn.Conv1d / nn.BatchNorm1d default initializers."""
    kw, kb = jax.random.split(key)
    fan_in = c_in * kernel_size
    bound = 1.0 / (fan_in ** 0.5)
    # PyTorch Conv1d weight is (out_ch, in_ch, k); we store (k, in_ch, out_ch)
    # so each tap is a plain (in, out) matmul against feature-last activations.
    w = jax.random.uniform(kw, (kernel_size, c_in, c_in), jnp.float32, -bound, bound)
    b = jax.random.uniform(kb, (c_in,), jnp.float32, -bound, bound)
    gamma = jnp.ones((c_in,), jnp.float32)   # BatchNorm1d.weight init
    beta = jnp.zeros((c_in,), jnp.float32)   # BatchNorm1d.bias init
    return w, b, gamma, beta


if __name__ == "__main__":
    key = jax.random.PRNGKey(0)
    kx, kp = jax.random.split(key)

    x = jax.random.normal(kx, (BATCH, SEQ_LEN, C_IN), jnp.float32)
    w, b, gamma, beta = init_params(kp, C_IN)

    y = conv_layer(x, w, b, gamma, beta)
    y = jax.block_until_ready(y)

    ref = conv_layer_ref(x, w, b, gamma, beta)

    Lc = SEQ_LEN + 2 * PAD - KERNEL + 1
    Lout = (Lc - 1) // 2 + 1
    assert y.shape == (BATCH, Lout, C_IN), y.shape
    assert jnp.allclose(y, ref, atol=1e-4, rtol=1e-4), float(jnp.max(jnp.abs(y - ref)))

    print("KERNEL_OK")
</pallas_src>

<mosaic_0001>
module attributes {stable_mosaic.version = 11 : i64} {
  func.func @_conv_layer_kernel(%arg0: i32, %arg1: memref<2x20x32xf32, #tpu.memory_space<vmem>>, %arg2: memref<3x32x32xf32, #tpu.memory_space<vmem>>, %arg3: memref<1x32xf32, #tpu.memory_space<vmem>>, %arg4: memref<1x32xf32, #tpu.memory_space<vmem>>, %arg5: memref<1x32xf32, #tpu.memory_space<vmem>>, %arg6: memref<2x9x32xf32, #tpu.memory_space<vmem>>) attributes {dimension_semantics = [#tpu.dimension_semantics<arbitrary>], iteration_bounds = array<i64: 1>, scalar_prefetch = 0 : i64, scratch_operands = 0 : i64, tpu.core_type = #tpu.core_type<tc>, window_params = [{pipeline_mode = #tpu.pipeline_mode<synchronous>, transform_indices = @transform_0, window_bounds = array<i64: 2, 20, 32>}, {pipeline_mode = #tpu.pipeline_mode<synchronous>, transform_indices = @transform_1, window_bounds = array<i64: 3, 32, 32>}, {pipeline_mode = #tpu.pipeline_mode<synchronous>, transform_indices = @transform_2, window_bounds = array<i64: 1, 32>}, {pipeline_mode = #tpu.pipeline_mode<synchronous>, transform_indices = @transform_3, window_bounds = array<i64: 1, 32>}, {pipeline_mode = #tpu.pipeline_mode<synchronous>, transform_indices = @transform_4, window_bounds = array<i64: 1, 32>}, {pipeline_mode = #tpu.pipeline_mode<synchronous>, transform_indices = @transform_5, window_bounds = array<i64: 2, 9, 32>}]} {
    %c0 = arith.constant 0 : index
    %c0_0 = arith.constant 0 : index
    %c0_1 = arith.constant 0 : index
    %0 = vector.load %arg1[%c0, %c0_0, %c0_1] : memref<2x20x32xf32, #tpu.memory_space<vmem>>, vector<1x20x32xf32>
    %1 = vector.shape_cast %0 : vector<1x20x32xf32> to vector<20x32xf32>
    %cst = arith.constant 0.000000e+00 : f32
    %2 = vector.broadcast %cst : f32 to vector<18x32xf32>
    %3 = vector.extract_strided_slice %1 {offsets = [0, 0], sizes = [18, 32], strides = [1, 1]} : vector<20x32xf32> to vector<18x32xf32>
    %c0_2 = arith.constant 0 : index
    %c0_3 = arith.constant 0 : index
    %c0_4 = arith.constant 0 : index
    %4 = vector.load %arg2[%c0_2, %c0_3, %c0_4] : memref<3x32x32xf32, #tpu.memory_space<vmem>>, vector<1x32x32xf32>
    %5 = vector.shape_cast %4 : vector<1x32x32xf32> to vector<32x32xf32>
    %cst_5 = arith.constant dense<0.000000e+00> : vector<18x32xf32>
    %6 = tpu.matmul %3, %5, %cst_5 {dimension_numbers = #tpu.dot_dimension_numbers<[1], [0], [0], [1], [0, 0, 1, 1], [], []>} : vector<18x32xf32>, vector<32x32xf32>, vector<18x32xf32> -> vector<18x32xf32>
    %7 = arith.addf %2, %6 : vector<18x32xf32>
    %8 = vector.extract_strided_slice %1 {offsets = [1, 0], sizes = [18, 32], strides = [1, 1]} : vector<20x32xf32> to vector<18x32xf32>
    %c1 = arith.constant 1 : index
    %c0_6 = arith.constant 0 : index
    %c0_7 = arith.constant 0 : index
    %9 = vector.load %arg2[%c1, %c0_6, %c0_7] : memref<3x32x32xf32, #tpu.memory_space<vmem>>, vector<1x32x32xf32>
    %10 = vector.shape_cast %9 : vector<1x32x32xf32> to vector<32x32xf32>
    %cst_8 = arith.constant dense<0.000000e+00> : vector<18x32xf32>
    %11 = tpu.matmul %8, %10, %cst_8 {dimension_numbers = #tpu.dot_dimension_numbers<[1], [0], [0], [1], [0, 0, 1, 1], [], []>} : vector<18x32xf32>, vector<32x32xf32>, vector<18x32xf32> -> vector<18x32xf32>
    %12 = arith.addf %7, %11 : vector<18x32xf32>
    %13 = vector.extract_strided_slice %1 {offsets = [2, 0], sizes = [18, 32], strides = [1, 1]} : vector<20x32xf32> to vector<18x32xf32>
    %c2 = arith.constant 2 : index
    %c0_9 = arith.constant 0 : index
    %c0_10 = arith.constant 0 : index
    %14 = vector.load %arg2[%c2, %c0_9, %c0_10] : memref<3x32x32xf32, #tpu.memory_space<vmem>>, vector<1x32x32xf32>
    %15 = vector.shape_cast %14 : vector<1x32x32xf32> to vector<32x32xf32>
    %cst_11 = arith.constant dense<0.000000e+00> : vector<18x32xf32>
    %16 = tpu.matmul %13, %15, %cst_11 {dimension_numbers = #tpu.dot_dimension_numbers<[1], [0], [0], [1], [0, 0, 1, 1], [], []>} : vector<18x32xf32>, vector<32x32xf32>, vector<18x32xf32> -> vector<18x32xf32>
    %17 = arith.addf %12, %16 : vector<18x32xf32>
    %c0_12 = arith.constant 0 : index
    %c0_13 = arith.constant 0 : index
    %18 = vector.load %arg3[%c0_12, %c0_13] : memref<1x32xf32, #tpu.memory_space<vmem>>, vector<1x32xf32>
    %19 = vector.broadcast %18 : vector<1x32xf32> to vector<18x32xf32>
    %20 = arith.addf %17, %19 : vector<18x32xf32>
    %c1_14 = arith.constant 1 : index
    %c0_15 = arith.constant 0 : index
    %c0_16 = arith.constant 0 : index
    %21 = vector.load %arg1[%c1_14, %c0_15, %c0_16] : memref<2x20x32xf32, #tpu.memory_space<vmem>>, vector<1x20x32xf32>
    %22 = vector.shape_cast %21 : vector<1x20x32xf32> to vector<20x32xf32>
    %cst_17 = arith.constant 0.000000e+00 : f32
    %23 = vector.broadcast %cst_17 : f32 to vector<18x32xf32>
    %24 = vector.extract_strided_slice %22 {offsets = [0, 0], sizes = [18, 32], strides = [1, 1]} : vector<20x32xf32> to vector<18x32xf32>
    %c0_18 = arith.constant 0 : index
    %c0_19 = arith.constant 0 : index
    %c0_20 = arith.constant 0 : index
    %25 = vector.load %arg2[%c0_18, %c0_19, %c0_20] : memref<3x32x32xf32, #tpu.memory_space<vmem>>, vector<1x32x32xf32>
    %26 = vector.shape_cast %25 : vector<1x32x32xf32> to vector<32x32xf32>
    %cst_21 = arith.constant dense<0.000000e+00> : vector<18x32xf32>
    %27 = tpu.matmul %24, %26, %cst_21 {dimension_numbers = #tpu.dot_dimension_numbers<[1], [0], [0], [1], [0, 0, 1, 1], [], []>} : vector<18x32xf32>, vector<32x32xf32>, vector<18x32xf32> -> vector<18x32xf32>
    %28 = arith.addf %23, %27 : vector<18x32xf32>
    %29 = vector.extract_strided_slice %22 {offsets = [1, 0], sizes = [18, 32], strides = [1, 1]} : vector<20x32xf32> to vector<18x32xf32>
    %c1_22 = arith.constant 1 : index
    %c0_23 = arith.constant 0 : index
    %c0_24 = arith.constant 0 : index
    %30 = vector.load %arg2[%c1_22, %c0_23, %c0_24] : memref<3x32x32xf32, #tpu.memory_space<vmem>>, vector<1x32x32xf32>
    %31 = vector.shape_cast %30 : vector<1x32x32xf32> to vector<32x32xf32>
    %cst_25 = arith.constant dense<0.000000e+00> : vector<18x32xf32>
    %32 = tpu.matmul %29, %31, %cst_25 {dimension_numbers = #tpu.dot_dimension_numbers<[1], [0], [0], [1], [0, 0, 1, 1], [], []>} : vector<18x32xf32>, vector<32x32xf32>, vector<18x32xf32> -> vector<18x32xf32>
    %33 = arith.addf %28, %32 : vector<18x32xf32>
    %34 = vector.extract_strided_slice %22 {offsets = [2, 0], sizes = [18, 32], strides = [1, 1]} : vector<20x32xf32> to vector<18x32xf32>
    %c2_26 = arith.constant 2 : index
    %c0_27 = arith.constant 0 : index
    %c0_28 = arith.constant 0 : index
    %35 = vector.load %arg2[%c2_26, %c0_27, %c0_28] : memref<3x32x32xf32, #tpu.memory_space<vmem>>, vector<1x32x32xf32>
    %36 = vector.shape_cast %35 : vector<1x32x32xf32> to vector<32x32xf32>
    %cst_29 = arith.constant dense<0.000000e+00> : vector<18x32xf32>
    %37 = tpu.matmul %34, %36, %cst_29 {dimension_numbers = #tpu.dot_dimension_numbers<[1], [0], [0], [1], [0, 0, 1, 1], [], []>} : vector<18x32xf32>, vector<32x32xf32>, vector<18x32xf32> -> vector<18x32xf32>
    %38 = arith.addf %33, %37 : vector<18x32xf32>
    %c0_30 = arith.constant 0 : index
    %c0_31 = arith.constant 0 : index
    %39 = vector.load %arg3[%c0_30, %c0_31] : memref<1x32xf32, #tpu.memory_space<vmem>>, vector<1x32xf32>
    %40 = vector.broadcast %39 : vector<1x32xf32> to vector<18x32xf32>
    %41 = arith.addf %38, %40 : vector<18x32xf32>
    %cst_32 = arith.constant dense<0.000000e+00> : vector<32xf32>
    %42 = vector.multi_reduction <add>, %20, %cst_32 [0] : vector<18x32xf32> to vector<32xf32>
    %43 = vector.shape_cast %42 : vector<32xf32> to vector<1x32xf32>
    %cst_33 = arith.constant 0.000000e+00 : f32
    %44 = vector.broadcast %cst_33 : f32 to vector<1x32xf32>
    %45 = arith.addf %44, %43 : vector<1x32xf32>
    %cst_34 = arith.constant dense<0.000000e+00> : vector<32xf32>
    %46 = vector.multi_reduction <add>, %41, %cst_34 [0] : vector<18x32xf32> to vector<32xf32>
    %47 = vector.shape_cast %46 : vector<32xf32> to vector<1x32xf32>
    %48 = arith.addf %45, %47 : vector<1x32xf32>
    %cst_35 = arith.constant 3.600000e+01 : f32
    %49 = vector.broadcast %cst_35 : f32 to vector<1x32xf32>
    %50 = arith.divf %48, %49 : vector<1x32xf32>
    %51 = vector.broadcast %50 : vector<1x32xf32> to vector<18x32xf32>
    %52 = arith.subf %20, %51 : vector<18x32xf32>
    %53 = arith.mulf %52, %52 : vector<18x32xf32>
    %cst_36 = arith.constant dense<0.000000e+00> : vector<32xf32>
    %54 = vector.multi_reduction <add>, %53, %cst_36 [0] : vector<18x32xf32> to vector<32xf32>
    %55 = vector.shape_cast %54 : vector<32xf32> to vector<1x32xf32>
    %cst_37 = arith.constant 0.000000e+00 : f32
    %56 = vector.broadcast %cst_37 : f32 to vector<1x32xf32>
    %57 = arith.addf %56, %55 : vector<1x32xf32>
    %58 = vector.broadcast %50 : vector<1x32xf32> to vector<18x32xf32>
    %59 = arith.subf %41, %58 : vector<18x32xf32>
    %60 = arith.mulf %59, %59 : vector<18x32xf32>
    %cst_38 = arith.constant dense<0.000000e+00> : vector<32xf32>
    %61 = vector.multi_reduction <add>, %60, %cst_38 [0] : vector<18x32xf32> to vector<32xf32>
    %62 = vector.shape_cast %61 : vector<32xf32> to vector<1x32xf32>
    %63 = arith.addf %57, %62 : vector<1x32xf32>
    %cst_39 = arith.constant 3.600000e+01 : f32
    %64 = vector.broadcast %cst_39 : f32 to vector<1x32xf32>
    %65 = arith.divf %63, %64 : vector<1x32xf32>
    %cst_40 = arith.constant 9.99999974E-6 : f32
    %66 = vector.broadcast %cst_40 : f32 to vector<1x32xf32>
    %67 = arith.addf %65, %66 : vector<1x32xf32>
    %68 = math.rsqrt %67 : vector<1x32xf32>
    %c0_41 = arith.constant 0 : index
    %c0_42 = arith.constant 0 : index
    %69 = vector.load %arg4[%c0_41, %c0_42] : memref<1x32xf32, #tpu.memory_space<vmem>>, vector<1x32xf32>
    %70 = arith.mulf %68, %69 : vector<1x32xf32>
    %c0_43 = arith.constant 0 : index
    %c0_44 = arith.constant 0 : index
    %71 = vector.load %arg5[%c0_43, %c0_44] : memref<1x32xf32, #tpu.memory_space<vmem>>, vector<1x32xf32>
    %72 = vector.broadcast %50 : vector<1x32xf32> to vector<18x32xf32>
    %73 = arith.subf %20, %72 : vector<18x32xf32>
    %74 = vector.broadcast %70 : vector<1x32xf32> to vector<18x32xf32>
    %75 = arith.mulf %73, %74 : vector<18x32xf32>
    %76 = vector.broadcast %71 : vector<1x32xf32> to vector<18x32xf32>
    %77 = arith.addf %75, %76 : vector<18x32xf32>
    %cst_45 = arith.constant 0.000000e+00 : f32
    %78 = vector.broadcast %cst_45 : f32 to vector<18x32xf32>
    %79 = arith.cmpf ogt, %77, %78 : vector<18x32xf32>
    %cst_46 = arith.constant 0.000000e+00 : f32
    %80 = vector.broadcast %cst_46 : f32 to vector<18x32xf32>
    %81 = arith.minimumf %77, %80 : vector<18x32xf32>
    %82 = math.exp %81 : vector<18x32xf32>
    %cst_47 = arith.constant 1.000000e+00 : f32
    %83 = vector.broadcast %cst_47 : f32 to vector<18x32xf32>
    %84 = arith.subf %82, %83 : vector<18x32xf32>
    %85 = arith.select %79, %77, %84 : vector<18x32xi1>, vector<18x32xf32>
    %86 = vector.extract_strided_slice %85 {offsets = [0, 0], sizes = [1, 32], strides = [1, 1]} : vector<18x32xf32> to vector<1x32xf32>
    %87 = vector.extract_strided_slice %85 {offsets = [1, 0], sizes = [1, 32], strides = [1, 1]} : vector<18x32xf32> to vector<1x32xf32>
    %88 = arith.maximumf %86, %87 : vector<1x32xf32>
    %89 = vector.extract_strided_slice %85 {offsets = [1, 0], sizes = [1, 32], strides = [1, 1]} : vector<18x32xf32> to vector<1x32xf32>
    %90 = vector.extract_strided_slice %85 {offsets = [2, 0], sizes = [1, 32], strides = [1, 1]} : vector<18x32xf32> to vector<1x32xf32>
    %91 = arith.maximumf %89, %90 : vector<1x32xf32>
    %92 = vector.extract_strided_slice %85 {offsets = [3, 0], sizes = [1, 32], strides = [1, 1]} : vector<18x32xf32> to vector<1x32xf32>
    %93 = arith.maximumf %91, %92 : vector<1x32xf32>
    %94 = vector.extract_strided_slice %85 {offsets = [3, 0], sizes = [1, 32], strides = [1, 1]} : vector<18x32xf32> to vector<1x32xf32>
    %95 = vector.extract_strided_slice %85 {offsets = [4, 0], sizes = [1, 32], strides = [1, 1]} : vector<18x32xf32> to vector<1x32xf32>
    %96 = arith.maximumf %94, %95 : vector<1x32xf32>
    %97 = vector.extract_strided_slice %85 {offsets = [5, 0], sizes = [1, 32], strides = [1, 1]} : vector<18x32xf32> to vector<1x32xf32>
    %98 = arith.maximumf %96, %97 : vector<1x32xf32>
    %99 = vector.extract_strided_slice %85 {offsets = [5, 0], sizes = [1, 32], strides = [1, 1]} : vector<18x32xf32> to vector<1x32xf32>
    %100 = vector.extract_strided_slice %85 {offsets = [6, 0], sizes = [1, 32], strides = [1, 1]} : vector<18x32xf32> to vector<1x32xf32>
    %101 = arith.maximumf %99, %100 : vector<1x32xf32>
    %102 = vector.extract_strided_slice %85 {offsets = [7, 0], sizes = [1, 32], strides = [1, 1]} : vector<18x32xf32> to vector<1x32xf32>
    %103 = arith.maximumf %101, %102 : vector<1x32xf32>
    %104 = vector.extract_strided_slice %85 {offsets = [7, 0], sizes = [1, 32], strides = [1, 1]} : vector<18x32xf32> to vector<1x32xf32>
    %105 = vector.extract_strided_slice %85 {offsets = [8, 0], sizes = [1, 32], strides = [1, 1]} : vector<18x32xf32> to vector<1x32xf32>
    %106 = arith.maximumf %104, %105 : vector<1x32xf32>
    %107 = vector.extract_strided_slice %85 {offsets = [9, 0], sizes = [1, 32], strides = [1, 1]} : vector<18x32xf32> to vector<1x32xf32>
    %108 = arith.maximumf %106, %107 : vector<1x32xf32>
    %109 = vector.extract_strided_slice %85 {offsets = [9, 0], sizes = [1, 32], strides = [1, 1]} : vector<18x32xf32> to vector<1x32xf32>
    %110 = vector.extract_strided_slice %85 {offsets = [10, 0], sizes = [1, 32], strides = [1, 1]} : vector<18x32xf32> to vector<1x32xf32>
    %111 = arith.maximumf %109, %110 : vector<1x32xf32>
    %112 = vector.extract_strided_slice %85 {offsets = [11, 0], sizes = [1, 32], strides = [1, 1]} : vector<18x32xf32> to vector<1x32xf32>
    %113 = arith.maximumf %111, %112 : vector<1x32xf32>
    %114 = vector.extract_strided_slice %85 {offsets = [11, 0], sizes = [1, 32], strides = [1, 1]} : vector<18x32xf32> to vector<1x32xf32>
    %115 = vector.extract_strided_slice %85 {offsets = [12, 0], sizes = [1, 32], strides = [1, 1]} : vector<18x32xf32> to vector<1x32xf32>
    %116 = arith.maximumf %114, %115 : vector<1x32xf32>
    %117 = vector.extract_strided_slice %85 {offsets = [13, 0], sizes = [1, 32], strides = [1, 1]} : vector<18x32xf32> to vector<1x32xf32>
    %118 = arith.maximumf %116, %117 : vector<1x32xf32>
    %119 = vector.extract_strided_slice %85 {offsets = [13, 0], sizes = [1, 32], strides = [1, 1]} : vector<18x32xf32> to vector<1x32xf32>
    %120 = vector.extract_strided_slice %85 {offsets = [14, 0], sizes = [1, 32], strides = [1, 1]} : vector<18x32xf32> to vector<1x32xf32>
    %121 = arith.maximumf %119, %120 : vector<1x32xf32>
    %122 = vector.extract_strided_slice %85 {offsets = [15, 0], sizes = [1, 32], strides = [1, 1]} : vector<18x32xf32> to vector<1x32xf32>
    %123 = arith.maximumf %121, %122 : vector<1x32xf32>
    %124 = vector.extract_strided_slice %85 {offsets = [15, 0], sizes = [1, 32], strides = [1, 1]} : vector<18x32xf32> to vector<1x32xf32>
    %125 = vector.extract_strided_slice %85 {offsets = [16, 0], sizes = [1, 32], strides = [1, 1]} : vector<18x32xf32> to vector<1x32xf32>
    %126 = arith.maximumf %124, %125 : vector<1x32xf32>
    %127 = vector.extract_strided_slice %85 {offsets = [17, 0], sizes = [1, 32], strides = [1, 1]} : vector<18x32xf32> to vector<1x32xf32>
    %128 = arith.maximumf %126, %127 : vector<1x32xf32>
    %129 = tpu.concatenate %88, %93, %98, %103, %108, %113, %118, %123, %128 in 0 : vector<1x32xf32>, vector<1x32xf32>, vector<1x32xf32>, vector<1x32xf32>, vector<1x32xf32>, vector<1x32xf32>, vector<1x32xf32>, vector<1x32xf32>, vector<1x32xf32> -> vector<9x32xf32>
    %c0_48 = arith.constant 0 : index
    %c0_49 = arith.constant 0 : index
    %c0_50 = arith.constant 0 : index
    %130 = vector.load %arg6[%c0_48, %c0_49, %c0_50] : memref<2x9x32xf32, #tpu.memory_space<vmem>>, vector<1x9x32xf32>
    %131 = vector.shape_cast %130 : vector<1x9x32xf32> to vector<9x32xf32>
    %132 = vector.shape_cast %129 : vector<9x32xf32> to vector<1x9x32xf32>
    tpu.vector_store %arg6[%c0_48, %c0_49, %c0_50], %132 {strides = array<i32>} : memref<2x9x32xf32, #tpu.memory_space<vmem>>, vector<1x9x32xf32>,
    %133 = vector.broadcast %50 : vector<1x32xf32> to vector<18x32xf32>
    %134 = arith.subf %41, %133 : vector<18x32xf32>
    %135 = vector.broadcast %70 : vector<1x32xf32> to vector<18x32xf32>
    %136 = arith.mulf %134, %135 : vector<18x32xf32>
    %137 = vector.broadcast %71 : vector<1x32xf32> to vector<18x32xf32>
    %138 = arith.addf %136, %137 : vector<18x32xf32>
    %cst_51 = arith.constant 0.000000e+00 : f32
    %139 = vector.broadcast %cst_51 : f32 to vector<18x32xf32>
    %140 = arith.cmpf ogt, %138, %139 : vector<18x32xf32>
    %cst_52 = arith.constant 0.000000e+00 : f32
    %141 = vector.broadcast %cst_52 : f32 to vector<18x32xf32>
    %142 = arith.minimumf %138, %141 : vector<18x32xf32>
    %143 = math.exp %142 : vector<18x32xf32>
    %cst_53 = arith.constant 1.000000e+00 : f32
    %144 = vector.broadcast %cst_53 : f32 to vector<18x32xf32>
    %145 = arith.subf %143, %144 : vector<18x32xf32>
    %146 = arith.select %140, %138, %145 : vector<18x32xi1>, vector<18x32xf32>
    %147 = vector.extract_strided_slice %146 {offsets = [0, 0], sizes = [1, 32], strides = [1, 1]} : vector<18x32xf32> to vector<1x32xf32>
    %148 = vector.extract_strided_slice %146 {offsets = [1, 0], sizes = [1, 32], strides = [1, 1]} : vector<18x32xf32> to vector<1x32xf32>
    %149 = arith.maximumf %147, %148 : vector<1x32xf32>
    %150 = vector.extract_strided_slice %146 {offsets = [1, 0], sizes = [1, 32], strides = [1, 1]} : vector<18x32xf32> to vector<1x32xf32>
    %151 = vector.extract_strided_slice %146 {offsets = [2, 0], sizes = [1, 32], strides = [1, 1]} : vector<18x32xf32> to vector<1x32xf32>
    %152 = arith.maximumf %150, %151 : vector<1x32xf32>
    %153 = vector.extract_strided_slice %146 {offsets = [3, 0], sizes = [1, 32], strides = [1, 1]} : vector<18x32xf32> to vector<1x32xf32>
    %154 = arith.maximumf %152, %153 : vector<1x32xf32>
    %155 = vector.extract_strided_slice %146 {offsets = [3, 0], sizes = [1, 32], strides = [1, 1]} : vector<18x32xf32> to vector<1x32xf32>
    %156 = vector.extract_strided_slice %146 {offsets = [4, 0], sizes = [1, 32], strides = [1, 1]} : vector<18x32xf32> to vector<1x32xf32>
    %157 = arith.maximumf %155, %156 : vector<1x32xf32>
    %158 = vector.extract_strided_slice %146 {offsets = [5, 0], sizes = [1, 32], strides = [1, 1]} : vector<18x32xf32> to vector<1x32xf32>
    %159 = arith.maximumf %157, %158 : vector<1x32xf32>
    %160 = vector.extract_strided_slice %146 {offsets = [5, 0], sizes = [1, 32], strides = [1, 1]} : vector<18x32xf32> to vector<1x32xf32>
    %161 = vector.extract_strided_slice %146 {offsets = [6, 0], sizes = [1, 32], strides = [1, 1]} : vector<18x32xf32> to vector<1x32xf32>
    %162 = arith.maximumf %160, %161 : vector<1x32xf32>
    %163 = vector.extract_strided_slice %146 {offsets = [7, 0], sizes = [1, 32], strides = [1, 1]} : vector<18x32xf32> to vector<1x32xf32>
    %164 = arith.maximumf %162, %163 : vector<1x32xf32>
    %165 = vector.extract_strided_slice %146 {offsets = [7, 0], sizes = [1, 32], strides = [1, 1]} : vector<18x32xf32> to vector<1x32xf32>
    %166 = vector.extract_strided_slice %146 {offsets = [8, 0], sizes = [1, 32], strides = [1, 1]} : vector<18x32xf32> to vector<1x32xf32>
    %167 = arith.maximumf %165, %166 : vector<1x32xf32>
    %168 = vector.extract_strided_slice %146 {offsets = [9, 0], sizes = [1, 32], strides = [1, 1]} : vector<18x32xf32> to vector<1x32xf32>
    %169 = arith.maximumf %167, %168 : vector<1x32xf32>
    %170 = vector.extract_strided_slice %146 {offsets = [9, 0], sizes = [1, 32], strides = [1, 1]} : vector<18x32xf32> to vector<1x32xf32>
    %171 = vector.extract_strided_slice %146 {offsets = [10, 0], sizes = [1, 32], strides = [1, 1]} : vector<18x32xf32> to vector<1x32xf32>
    %172 = arith.maximumf %170, %171 : vector<1x32xf32>
    %173 = vector.extract_strided_slice %146 {offsets = [11, 0], sizes = [1, 32], strides = [1, 1]} : vector<18x32xf32> to vector<1x32xf32>
    %174 = arith.maximumf %172, %173 : vector<1x32xf32>
    %175 = vector.extract_strided_slice %146 {offsets = [11, 0], sizes = [1, 32], strides = [1, 1]} : vector<18x32xf32> to vector<1x32xf32>
    %176 = vector.extract_strided_slice %146 {offsets = [12, 0], sizes = [1, 32], strides = [1, 1]} : vector<18x32xf32> to vector<1x32xf32>
    %177 = arith.maximumf %175, %176 : vector<1x32xf32>
    %178 = vector.extract_strided_slice %146 {offsets = [13, 0], sizes = [1, 32], strides = [1, 1]} : vector<18x32xf32> to vector<1x32xf32>
    %179 = arith.maximumf %177, %178 : vector<1x32xf32>
    %180 = vector.extract_strided_slice %146 {offsets = [13, 0], sizes = [1, 32], strides = [1, 1]} : vector<18x32xf32> to vector<1x32xf32>
    %181 = vector.extract_strided_slice %146 {offsets = [14, 0], sizes = [1, 32], strides = [1, 1]} : vector<18x32xf32> to vector<1x32xf32>
    %182 = arith.maximumf %180, %181 : vector<1x32xf32>
    %183 = vector.extract_strided_slice %146 {offsets = [15, 0], sizes = [1, 32], strides = [1, 1]} : vector<18x32xf32> to vector<1x32xf32>
    %184 = arith.maximumf %182, %183 : vector<1x32xf32>
    %185 = vector.extract_strided_slice %146 {offsets = [15, 0], sizes = [1, 32], strides = [1, 1]} : vector<18x32xf32> to vector<1x32xf32>
    %186 = vector.extract_strided_slice %146 {offsets = [16, 0], sizes = [1, 32], strides = [1, 1]} : vector<18x32xf32> to vector<1x32xf32>
    %187 = arith.maximumf %185, %186 : vector<1x32xf32>
    %188 = vector.extract_strided_slice %146 {offsets = [17, 0], sizes = [1, 32], strides = [1, 1]} : vector<18x32xf32> to vector<1x32xf32>
    %189 = arith.maximumf %187, %188 : vector<1x32xf32>
    %190 = tpu.concatenate %149, %154, %159, %164, %169, %174, %179, %184, %189 in 0 : vector<1x32xf32>, vector<1x32xf32>, vector<1x32xf32>, vector<1x32xf32>, vector<1x32xf32>, vector<1x32xf32>, vector<1x32xf32>, vector<1x32xf32>, vector<1x32xf32> -> vector<9x32xf32>
    %c1_54 = arith.constant 1 : index
    %c0_55 = arith.constant 0 : index
    %c0_56 = arith.constant 0 : index
    %191 = vector.load %arg6[%c1_54, %c0_55, %c0_56] : memref<2x9x32xf32, #tpu.memory_space<vmem>>, vector<1x9x32xf32>
    %192 = vector.shape_cast %191 : vector<1x9x32xf32> to vector<9x32xf32>
    %193 = vector.shape_cast %190 : vector<9x32xf32> to vector<1x9x32xf32>
    tpu.vector_store %arg6[%c1_54, %c0_55, %c0_56], %193 {strides = array<i32>} : memref<2x9x32xf32, #tpu.memory_space<vmem>>, vector<1x9x32xf32>,
    return
  }
  func.func @transform_0(%arg0: i32) -> (i32, i32, i32) {
    %c0_i32 = arith.constant 0 : i32
    %c0_i32_0 = arith.constant 0 : i32
    %c0_i32_1 = arith.constant 0 : i32
    %c0_i32_2 = arith.constant 0 : i32
    return %c0_i32, %c0_i32_0, %c0_i32_1 : i32, i32, i32
  }
  func.func @transform_1(%arg0: i32) -> (i32, i32, i32) {
    %c0_i32 = arith.constant 0 : i32
    %c0_i32_0 = arith.constant 0 : i32
    %c0_i32_1 = arith.constant 0 : i32
    %c0_i32_2 = arith.constant 0 : i32
    return %c0_i32, %c0_i32_0, %c0_i32_1 : i32, i32, i32
  }
  func.func @transform_2(%arg0: i32) -> (i32, i32) {
    %c0_i32 = arith.constant 0 : i32
    %c0_i32_0 = arith.constant 0 : i32
    %c0_i32_1 = arith.constant 0 : i32
    return %c0_i32, %c0_i32_0 : i32, i32
  }
  func.func @transform_3(%arg0: i32) -> (i32, i32) {
    %c0_i32 = arith.constant 0 : i32
    %c0_i32_0 = arith.constant 0 : i32
    %c0_i32_1 = arith.constant 0 : i32
    return %c0_i32, %c0_i32_0 : i32, i32
  }
  func.func @transform_4(%arg0: i32) -> (i32, i32) {
    %c0_i32 = arith.constant 0 : i32
    %c0_i32_0 = arith.constant 0 : i32
    %c0_i32_1 = arith.constant 0 : i32
    return %c0_i32, %c0_i32_0 : i32, i32
  }
  func.func @transform_5(%arg0: i32) -> (i32, i32, i32) {
    %c0_i32 = arith.constant 0 : i32
    %c0_i32_0 = arith.constant 0 : i32
    %c0_i32_1 = arith.constant 0 : i32
    %c0_i32_2 = arith.constant 0 : i32
    return %c0_i32, %c0_i32_0, %c0_i32_1 : i32, i32, i32
  }
}

</mosaic_0001>

<bundles_post_ra>
// kernel: tpu_custom_call.1
= control target key start
LH: loop header
LB: loop body
LE: loop exit
PB: predicated region body
PF: predicated region fallthrough
CT: control target
= control target key end

     0   :  { %10 = vsyncpa [#allocation3], 0  ;;  %s627_s21 = smov [#allocation2]   ;;  %s628_s23 = smov 128   ;;  %s779_s0 = inlined_call_operand.vmem [shape: f32[2,20,32], index: 0, kind: input, shape index: {}]   ;;  %s780_s1 = inlined_call_operand.hbm [shape: f32[3,32,32], index: 1, kind: input, shape index: {}]   ;;  %s781_s2 = inlined_call_operand.vmem [shape: f32[1,32], index: 2, kind: input, shape index: {}]   ;;  %s782_s3 = inlined_call_operand.vmem [shape: f32[1,32], index: 3, kind: input, shape index: {}]   ;;  %s783_s4 = inlined_call_operand.vmem [shape: f32[1,32], index: 4, kind: input, shape index: {}]   ;;  %s784_s5 = inlined_call_operand.vmem [shape: f32[2,9,32], index: 5, kind: output, shape index: {}]  }
   0x1   :  { %s17_s20 = sshll.u32 %s780_s1, 4  ;;  %s19_s22 = sshll.u32 %s627_s21, 4  ;;  %s18_s20 = int_to_ptr.hbm [resolvable:$true] %s17_s20  ;;  %s20_s22 = int_to_ptr.vmem [resolvable:$true] %s19_s22 }
   0x2   :  { %s629_s24 = smov 8  }
   0x3   :  { %25 = dma.hbm_to_vmem [thread:$0]  %s18_s20, 1536, %s20_s22, [#allocation3], %s628_s23, %s628_s23, %s629_s24  }
   0x4   :  { %625 = dma.done.wait [#allocation3], 1536  }
   0x5   :  { %626 = vsyncadd [#allocation3], 4294965760  ;;  %v47_v0 = vld [vmem:[#allocation2 + $0x38] sm:$0xff]  ;;  %v46_v2 = vld [vmem:[#allocation2 + $0x30] sm:$0xff]  ;;  %vm51_vm0 = vcmask 1046528   ;;  %vm57_vm1 = vcmask 261120  }
   0x6   :  { %v42_v1 = vld [vmem:[#allocation2 + $0x18] sm:$0xff]  ;;  %571 = vmatpush.msra.mxu2 %v47_v0  ;;  %v41_v3 = vld [vmem:[#allocation2 + $0x10] sm:$0xff]  ;;  %v45_v4 = vld [vmem:[#allocation2 + $0x28] sm:$0xff]  ;;  %76 = vmatpush.msra.mxu0 %v47_v0  ;;  %vm127_vm2 = vcmask 1045504   ;;  %v630_v60 = vmov 36.0   ;;  %vm297_vm3 = vcmask 254976  }
   0x7   :  { %575 = vmatpush.msra.mxu3 %v42_v1  ;;  %v40_v5 = vld [vmem:[#allocation2 + $0x8] sm:$0xff]  ;;  %108 = vmatpush.msra.mxu1 %v42_v1  ;;  %v672_v7 = vld [vmem:[%s779_s0 + $0x10] sm:$0xf]  ;;  %v44_v9 = vld [vmem:[#allocation2 + $0x20] sm:$0xff]  ;;  %585 = vrcp.f32 %v630_v60  ;;  %vm447_vm8 = vcmask 1040384   ;;  %vm449_vm9 = vcmask 1041408  }
   0x8   :  { %v667_v6 = vld [vmem:[%s779_s0 + $0x8] sm:$0xff]  ;;  %572 = vmatpush.msra.mxu2 %v46_v2  ;;  %v39_v10 = vld [vmem:[#allocation2] sm:$0xff]  ;;  %v55_v11 = vrot.slane %v672_v7, 1  ;;  %77 = vmatpush.msra.mxu0 %v46_v2  ;;  %v126_v15 = vld [vmem:[#allocation2 + $0x58] sm:$0xff]  ;;  %v131_v33 = vrot.slane %v672_v7, 2  ;;  %vm451_vm13 = vcmask 1042432  }
   0x9   :  { %576 = vmatpush.msra.mxu3 %v41_v3  ;;  %v53_v8 = vrot.slane %v667_v6, 1  ;;  %109 = vmatpush.msra.mxu1 %v41_v3  ;;  %v36_v12 = vld [vmem:[%s779_s0] sm:$0xff]  ;;  %v125_v16 = vld [vmem:[#allocation2 + $0x50] sm:$0xff]  ;;  %v124_v18 = vld [vmem:[#allocation2 + $0x48] sm:$0xff]  ;;  %v129_v25 = vrot.slane %v667_v6, 2  ;;  %vm453_vm14 = vcmask 1043456  }
   0xa   :  { %573 = vmatpush.msra.mxu2 %v45_v4  ;;  %v52_v13 = vrot.slane %v36_v12, 1  ;;  %78 = vmatpush.msra.mxu0 %v45_v4  ;;  %v123_v19 = vld [vmem:[#allocation2 + $0x40] sm:$0xff]  ;;  %v551_v20 = vld [vmem:[%s779_s0 + $0x18] sm:$0xff]  ;;  %v128_v24 = vrot.slane %v36_v12, 2  ;;  %v553_v31 = vld [vmem:[%s779_s0 + $0x28] sm:$0xf] }
   0xb   :  { %577 = vmatpush.msra.mxu3 %v40_v5  ;;  %v56_v14 = vsel %vm51_vm0, %v53_v8, %v55_v11  ;;  %110 = vmatpush.msra.mxu1 %v40_v5  ;;  %v552_v21 = vld [vmem:[%s779_s0 + $0x20] sm:$0xff]  ;;  %v251_v22 = vrot.slane %v551_v20, 2  ;;  %v182_v26 = vrot.slane %v551_v20, 1  ;;  %v254_v32 = vrot.slane %v553_v31, 2 }
   0xc   :  { %574 = vmatpush.msra.mxu2 %v44_v9  ;;  %v54_v17 = vsel %vm51_vm0, %v52_v13, %v53_v8  ;;  %79 = vmatpush.msra.mxu0 %v44_v9  ;;  %v252_v23 = vrot.slane %v552_v21, 2  ;;  %v183_v27 = vrot.slane %v552_v21, 1  ;;  %v130_v29 = vsel %vm127_vm2, %v128_v24, %v129_v25  ;;  %v583_v58 = vld [vmem:[%s781_s2] ss:$0 sm:$0xff] }
   0xd   :  { %578 = vmatpush.msra.mxu3 %v39_v10  ;;  %543 = vmatmul.msk.f32.vlgmr.msra.gmra.mxu2 %vm57_vm1, %v56_v14  ;;  %v185_v34 = vrot.slane %v553_v31, 1  ;;  %v132_v36 = vsel %vm127_vm2, %v129_v25, %v131_v33  ;;  %vm460_vm15 = vcmask 253952  }
   0xe   :  { %546 = vmatmul.msk.f32.vlgmr.msra.gmra.mxu3 %vm57_vm1, %v667_v6  ;;  %151 = vmatpush.msrb.mxu2 %v126_v15  ;;  %v253_v28 = vsel %vm127_vm2, %v251_v22, %v252_v23  ;;  %v184_v30 = vsel %vm51_vm0, %v182_v26, %v183_v27  ;;  %v255_v35 = vsel %vm127_vm2, %v252_v23, %v254_v32 }
   0xf   :  { %205 = vmatpush.msrb.mxu3 %v47_v0  ;;  %111 = vmatpush.msra.mxu1 %v39_v10  ;;  %v186_v37 = vsel %vm51_vm0, %v183_v27, %v185_v34 }
  0x10   :  { %152 = vmatpush.msrb.mxu2 %v125_v16  ;;  %542 = vmatmul.msk.f32.vlgmr.msra.gmra.mxu0 %vm57_vm1, %v54_v17 }
  0x11   :  { %206 = vmatpush.msrb.mxu3 %v46_v2  ;;  %545 = vmatmul.msk.f32.vlgmr.msra.gmra.mxu1 %vm57_vm1, %v36_v12 }
  0x12   :  { %153 = vmatpush.msrb.mxu2 %v124_v18  ;;  %237 = vmatpush.msrb.mxu0 %v42_v1 }
  0x13   :  { %207 = vmatpush.msrb.mxu3 %v45_v4  ;;  %274 = vmatpush.msrb.mxu1 %v126_v15 }
  0x14   :  { %154 = vmatpush.msrb.mxu2 %v123_v19  ;;  %238 = vmatpush.msrb.mxu0 %v41_v3 }
  0x15   :  { %208 = vmatpush.msrb.mxu3 %v44_v9  ;;  %544 = vmatmul.msk.f32.gmra.mxu2 %vm57_vm1, %v55_v11 }
  0x16   :  { %547 = vmatmul.msk.f32.gmra.mxu3 %vm57_vm1, %v672_v7  ;;  %275 = vmatpush.msrb.mxu1 %v125_v16 }
  0x17   :  { %239 = vmatpush.msrb.mxu0 %v40_v5 }
  0x18   :  { %276 = vmatpush.msrb.mxu1 %v124_v18 }
  0x19   :  { %240 = vmatpush.msrb.mxu0 %v39_v10  ;;  %v586_v10 = vpop.eup %585 }
  0x1a   :  { %277 = vmatpush.msrb.mxu1 %v123_v19  ;;  %557 = vmatmul.msk.f32.vlgmr.msrb.gmra.mxu0 %vm57_vm1, %v551_v20  ;;  %v320_v19 = vmul.f32 36.0, %v586_v10  ;;  %vm324_vm4 = vweird.f32 %v586_v10 }
  0x1b   :  { %560 = vmatmul.msk.f32.vlgmr.msrb.gmra.mxu1 %vm57_vm1, %v253_v28 }
  0x1c   :  { %v321_v25 = vsub.f32 1.0, %v320_v19 }
  0x1d   :  { %548 = vmatmul.msk.f32.vlgmr.msrb.gmra.mxu2 %vm57_vm1, %v130_v29 }
  0x1e   :  { %554 = vmatmul.msk.f32.vlgmr.msrb.gmra.mxu3 %vm57_vm1, %v184_v30  ;;  %v322_v30 = vmul.f32 %v586_v10, %v321_v25  ;;  %v584_v25 = vld [vmem:[%s783_s4] ss:$0 sm:$0xff] }
  0x22   :  { %558 = vmatmul.msk.f32.gmra.mxu0 %vm57_vm1, %v552_v21 }
  0x23   :  { %561 = vmatmul.msk.f32.gmra.mxu1 %vm57_vm1, %v255_v35  ;;  %v323_v35 = vadd.f32 %v586_v10, %v322_v30 }
  0x25   :  { %549 = vmatmul.msk.f32.gmra.mxu2 %vm57_vm1, %v132_v36 }
  0x26   :  { %555 = vmatmul.msk.f32.gmra.mxu3 %vm57_vm1, %v186_v37 }
  0x2a   :  { %559 = vmatmul.msk.f32.gmra.mxu0 %vm57_vm1, %v553_v31 }
  0x2b   :  { %562 = vmatmul.msk.f32.gmra.mxu1 %vm57_vm1, %v254_v32 }
  0x2d   :  { %550 = vmatmul.msk.f32.gmra.mxu2 %vm57_vm1, %v131_v33 }
  0x2e   :  { %556 = vmatmul.msk.f32.gmra.mxu3 %vm57_vm1, %v185_v34 }
  0x8d   :  { %v81_v38 = vpop.f32.mrf.mxu0 }
  0x8e   :  { %v113_v41 = vpop.f32.mrf.mxu1 }
  0x8f   :  { %v114_v51 = vadd.f32 %v113_v41, %v81_v38 }
  0x90   :  { %v84_v39 = vpop.f32.mrf.mxu2 }
  0x91   :  { %v116_v40 = vpop.f32.mrf.mxu3 }
  0x92   :  { %v117_v50 = vadd.f32 %v116_v40, %v84_v39  ;;  %v325_v39 = vsel %vm324_vm4, %v586_v10, %v323_v35 }
  0x97   :  { %v242_v44 = vpop.f32.mrf.mxu0 }
  0x98   :  { %v87_v42 = vpop.f32.mrf.mxu2  ;;  %v279_v45 = vpop.f32.mrf.mxu1 }
  0x99   :  { %v119_v43 = vpop.f32.mrf.mxu3 }
  0x9a   :  { %v120_v0 = vadd.f32 %v119_v43, %v87_v42 }
  0x9f   :  { %v245_v48 = vpop.f32.mrf.mxu0 }
  0xa0   :  { %v156_v46 = vpop.f32.mrf.mxu2  ;;  %v282_v49 = vpop.f32.mrf.mxu1 }
  0xa1   :  { %v210_v47 = vpop.f32.mrf.mxu3  ;;  %v165_v57 = vadd.f32 %v156_v46, %v114_v51 }
  0xa2   :  { %v243_v54 = vadd.f32 %v242_v44, %v210_v47 }
  0xa3   :  { %v172_v1 = vadd.f32 %v583_v58, %v165_v57 }
  0xa4   :  { %v288_v61 = vadd.f32 %v279_v45, %v243_v54 }
  0xa5   :  { %v294_v11 = vsel %vm57_vm1, %v172_v1, 0.0 }
  0xa6   :  { %v291_v6 = vadd.f32 %v583_v58, %v288_v61 }
  0xa7   :  { %v248_v63 = vpop.f32.mrf.mxu0 }
  0xa8   :  { %v159_v52 = vpop.f32.mrf.mxu2  ;;  %v285_v3 = vpop.f32.mrf.mxu1  ;;  %v307_v16 = vsel %vm57_vm1, %v291_v6, 0.0 }
  0xa9   :  { %v213_v53 = vpop.f32.mrf.mxu3  ;;  %v166_v55 = vadd.f32 %v159_v52, %v117_v50 }
  0xaa   :  { %v246_v56 = vadd.f32 %v245_v48, %v213_v53 }
  0xab   :  { %v173_v62 = vadd.f32 %v583_v58, %v166_v55 }
  0xac   :  { %v289_v59 = vadd.f32 %v282_v49, %v246_v56 }
  0xad   :  { %v295_v7 = vsel %vm57_vm1, %v173_v62, 0.0 }
  0xae   :  { %v292_v2 = vadd.f32 %v583_v58, %v289_v59  ;;  %v296_v15 = vadd.f32 %v295_v7, %v294_v11 }
  0xb0   :  { %v162_v4 = vpop.f32.mrf.mxu2  ;;  %v308_v12 = vsel %vm57_vm1, %v292_v2, 0.0 }
  0xb1   :  { %v216_v5 = vpop.f32.mrf.mxu3  ;;  %v167_v8 = vadd.f32 %v162_v4, %v120_v0  ;;  %v309_v20 = vadd.f32 %v308_v12, %v307_v16 }
  0xb2   :  { %v249_v9 = vadd.f32 %v248_v63, %v216_v5 }
  0xb3   :  { %v174_v13 = vadd.f32 %v583_v58, %v167_v8 }
  0xb4   :  { %v290_v14 = vadd.f32 %v285_v3, %v249_v9 }
  0xb5   :  { %v298_v17 = vsel %vm297_vm3, %v174_v13, 0.0 }
  0xb6   :  { %v293_v18 = vadd.f32 %v583_v58, %v290_v14  ;;  %v299_v21 = vadd.f32 %v298_v17, %v296_v15 }
  0xb8   :  { %v310_v22 = vsel %vm297_vm3, %v293_v18, 0.0  ;;  %v300_v23 = vrot.slane %v299_v21, 4 }
  0xb9   :  { %v311_v24 = vadd.f32 %v310_v22, %v309_v20 }
  0xba   :  { %v301_v26 = vadd.f32 %v300_v23, %v299_v21  ;;  %v375_v21 = vld [vmem:[%s782_s3] sm:$0x1] }
  0xbb   :  { %v312_v27 = vrot.slane %v311_v24, 4 }
  0xbc   :  { %v302_v28 = vrot.slane %v301_v26, 2 }
  0xbd   :  { %v313_v29 = vadd.f32 %v312_v27, %v311_v24 }
  0xbe   :  { %v303_v31 = vadd.f32 %v302_v28, %v301_v26 }
  0xbf   :  { %v314_v32 = vrot.slane %v313_v29, 2 }
  0xc0   :  { %v304_v33 = vrot.slane %v303_v31, 1 }
  0xc1   :  { %v315_v34 = vadd.f32 %v314_v32, %v313_v29 }
  0xc2   :  { %v305_v37 = vadd.f32 %v304_v33, %v303_v31 }
  0xc3   :  { %v316_v36 = vrot.slane %v315_v34, 1 }
  0xc5   :  { %v317_v38 = vadd.f32 %v316_v36, %v315_v34 }
  0xc7   :  { %v318_v40 = vadd.f32 %v317_v38, %v305_v37 }
  0xc9   :  { %v326_v41 = vmul.f32 %v325_v39, %v318_v40 }
  0xcb   :  { %v327_v42 = vsub.f32 %v172_v1, %v326_v41  ;;  %v328_v43 = vsub.f32 %v173_v62, %v326_v41  ;;  %v329_v44 = vsub.f32 %v174_v13, %v326_v41  ;;  %v345_v45 = vsub.f32 %v291_v6, %v326_v41 }
  0xcc   :  { %v346_v46 = vsub.f32 %v292_v2, %v326_v41  ;;  %v347_v47 = vsub.f32 %v293_v18, %v326_v41 }
  0xcd   :  { %v330_v48 = vmul.f32 %v327_v42, %v327_v42  ;;  %v331_v49 = vmul.f32 %v328_v43, %v328_v43  ;;  %v332_v50 = vmul.f32 %v329_v44, %v329_v44  ;;  %v348_v51 = vmul.f32 %v345_v45, %v345_v45 }
  0xce   :  { %v349_v52 = vmul.f32 %v346_v46, %v346_v46  ;;  %v350_v53 = vmul.f32 %v347_v47, %v347_v47 }
  0xcf   :  { %v333_v54 = vsel %vm57_vm1, %v330_v48, 0.0  ;;  %v334_v55 = vsel %vm57_vm1, %v331_v49, 0.0  ;;  %v351_v56 = vsel %vm57_vm1, %v348_v51, 0.0  ;;  %v336_v59 = vsel %vm297_vm3, %v332_v50, 0.0 }
  0xd0   :  { %v335_v57 = vadd.f32 %v334_v55, %v333_v54  ;;  %v352_v58 = vsel %vm57_vm1, %v349_v52, 0.0  ;;  %v354_v62 = vsel %vm297_vm3, %v350_v53, 0.0 }
  0xd1   :  { %v353_v60 = vadd.f32 %v352_v58, %v351_v56 }
  0xd2   :  { %v337_v61 = vadd.f32 %v336_v59, %v335_v57 }
  0xd3   :  { %v355_v63 = vadd.f32 %v354_v62, %v353_v60 }
  0xd4   :  { %v338_v0 = vrot.slane %v337_v61, 4 }
  0xd5   :  { %v356_v1 = vrot.slane %v355_v63, 4 }
  0xd6   :  { %v339_v2 = vadd.f32 %v338_v0, %v337_v61 }
  0xd7   :  { %v357_v3 = vadd.f32 %v356_v1, %v355_v63 }
  0xd8   :  { %v340_v4 = vrot.slane %v339_v2, 2 }
  0xd9   :  { %v358_v5 = vrot.slane %v357_v3, 2 }
  0xda   :  { %v341_v6 = vadd.f32 %v340_v4, %v339_v2 }
  0xdb   :  { %v359_v7 = vadd.f32 %v358_v5, %v357_v3 }
  0xdc   :  { %v342_v8 = vrot.slane %v341_v6, 1 }
  0xdd   :  { %v360_v9 = vrot.slane %v359_v7, 1 }
  0xde   :  { %v343_v10 = vadd.f32 %v342_v8, %v341_v6 }
  0xdf   :  { %v361_v11 = vadd.f32 %v360_v9, %v359_v7 }
  0xe1   :  { %v362_v12 = vadd.f32 %v361_v11, %v343_v10 }
  0xe3   :  { %v363_v13 = vmul.f32 %v362_v12, %v325_v39 }
  0xe5   :  { %v364_v14 = vadd.f32 1e-05, %v363_v13 }
  0xe7   :  { %587 = vrsqrt.f32 %v364_v14  ;;  %vm371_vm6 = vweird.f32 %v364_v14 }
  0xed   :  { %v588_v15 = vpop.eup %587 }
  0xee   :  { %v366_v16 = vmul.f32 %v588_v15, %v364_v14  ;;  %vm372_vm5 = vweird.f32 %v588_v15 }
  0xef   :  { %vm373_vm7 = vmor %vm371_vm6, %vm372_vm5  ;;  %vm455_vm5 = vcmask 1044480  }
  0xf0   :  { %v367_v17 = vmul.f32 %v588_v15, %v366_v16 }
  0xf2   :  { %v368_v18 = vmul.f32 0.5, %v367_v17 }
  0xf4   :  { %v369_v19 = vsub.f32 1.5, %v368_v18 }
  0xf6   :  { %v370_v20 = vmul.f32 %v588_v15, %v369_v19 }
  0xf8   :  { %v374_v22 = vsel %vm373_vm7, %v588_v15, %v370_v20 }
  0xf9   :  { %v376_v23 = vmul.f32 %v375_v21, %v374_v22 }
  0xfb   :  { %v378_v24 = vperm.slane %v376_v23, 0 }
  0xfd   :  { %v379_v26 = vmul.f32 %v378_v24, %v327_v42  ;;  %v380_v27 = vmul.f32 %v378_v24, %v328_v43  ;;  %v381_v28 = vmul.f32 %v378_v24, %v329_v44  ;;  %v462_v29 = vmul.f32 %v378_v24, %v345_v45 }
  0xfe   :  { %v463_v30 = vmul.f32 %v378_v24, %v346_v46  ;;  %v464_v31 = vmul.f32 %v378_v24, %v347_v47 }
  0xff   :  { %v385_v32 = vadd.f32 %v584_v25, %v379_v26  ;;  %v386_v33 = vadd.f32 %v584_v25, %v380_v27  ;;  %v387_v34 = vadd.f32 %v584_v25, %v381_v28  ;;  %v465_v35 = vadd.f32 %v584_v25, %v462_v29 }
 0x100   :  { %v466_v36 = vadd.f32 %v584_v25, %v463_v30  ;;  %v739_v37 = vadd.f32 %v584_v25, %v464_v31 }
 0x101   :  { %v391_v38 = vmin.f32 %v385_v32, 0.0  ;;  %v392_v39 = vmin.f32 %v386_v33, 0.0  ;;  %v393_v40 = vmin.f32 %v387_v34, 0.0  ;;  %v471_v48 = vmin.f32 %v465_v35, 0.0 }
 0x102   :  { %v472_v49 = vmin.f32 %v466_v36, 0.0  ;;  %v473_v43 = vmin.f32 %v739_v37, 0.0  ;;  %vm388_vm10 = vcmp.gt.f32.partialorder %v385_v32, 0.0  ;;  %vm389_vm11 = vcmp.gt.f32.partialorder %v386_v33, 0.0 }
 0x103   :  { %v394_v41 = vmul.f32 1.442695, %v391_v38  ;;  %v396_v50 = vmul.f32 1.442695, %v392_v39  ;;  %v398_v42 = vmul.f32 1.442695, %v393_v40 }
 0x104   :  { %v474_v44 = vmul.f32 1.442695, %v471_v48  ;;  %v476_v45 = vmul.f32 1.442695, %v472_v49  ;;  %v478_v46 = vmul.f32 1.442695, %v473_v43 }
 0x105   :  { %589 = vpow2.f32 %v394_v41  ;;  %vm390_vm12 = vcmp.gt.f32.partialorder %v387_v34, 0.0  ;;  %vm468_vm3 = vcmp.gt.f32.partialorder %v465_v35, 0.0  ;;  %vm469_vm4 = vcmp.gt.f32.partialorder %v466_v36, 0.0 }
 0x106   :  { %591 = vpow2.f32 %v396_v50  ;;  %vm470_vm6 = vcmp.gt.f32.partialorder %v739_v37, 0.0 }
 0x107   :  { %593 = vpow2.f32 %v398_v42 }
 0x108   :  { %595 = vpow2.f32 %v474_v44 }
 0x109   :  { %597 = vpow2.f32 %v476_v45 }
 0x10a   :  { %599 = vpow2.f32 %v478_v46 }
 0x10b   :  { %v590_v47 = vpop.eup %589 }
 0x10c   :  { %v592_v51 = vpop.eup %591  ;;  %v563_v52 = vadd.f32 -1.0, %v590_v47 }
 0x10d   :  { %v594_v53 = vpop.eup %593  ;;  %v564_v54 = vadd.f32 -1.0, %v592_v51 }
 0x10e   :  { %v596_v55 = vpop.eup %595  ;;  %v565_v56 = vadd.f32 -1.0, %v594_v53  ;;  %v403_v57 = vsel %vm388_vm10, %v385_v32, %v563_v52 }
 0x10f   :  { %v598_v58 = vpop.eup %597  ;;  %v404_v59 = vsel %vm389_vm11, %v386_v33, %v564_v54  ;;  %v407_v60 = vrot.slane %v403_v57, 1  ;;  %v566_v61 = vadd.f32 -1.0, %v596_v55  ;;  %v410_v0 = vrot.slane %v403_v57, 2 }
 0x110   :  { %v600_v62 = vpop.eup %599  ;;  %v405_v63 = vsel %vm390_vm12, %v387_v34, %v565_v56  ;;  %v414_v1 = vrot.slane %v404_v59, 1  ;;  %v567_v2 = vadd.f32 -1.0, %v598_v58  ;;  %v417_v4 = vrot.slane %v404_v59, 2 }
 0x111   :  { %v409_v3 = vmax.f32 %v403_v57, %v407_v60  ;;  %v423_v5 = vrot.slane %v405_v63, 1  ;;  %v568_v6 = vadd.f32 -1.0, %v600_v62  ;;  %v483_v9 = vsel %vm468_vm3, %v465_v35, %v566_v61 }
 0x112   :  { %v416_v7 = vmax.f32 %v403_v57, %v414_v1  ;;  %v420_v8 = vmax.f32 %v404_v59, %v414_v1  ;;  %v484_v10 = vsel %vm469_vm4, %v466_v36, %v567_v2  ;;  %v426_v13 = vrot.slane %v405_v63, 2 }
 0x113   :  { %v412_v11 = vmax.f32 %v409_v3, %v410_v0  ;;  %v425_v12 = vmax.f32 %v404_v59, %v423_v5  ;;  %v487_v14 = vrot.slane %v483_v9, 1  ;;  %v485_v17 = vsel %vm470_vm6, %v739_v37, %v568_v6 }
 0x114   :  { %v419_v15 = vmax.f32 %v416_v7, %v417_v4  ;;  %v421_v16 = vmax.f32 %v420_v8, %v417_v4  ;;  %v494_v18 = vrot.slane %v484_v10, 1  ;;  %v490_v26 = vrot.slane %v483_v9, 2 }
 0x115   :  { %v428_v19 = vmax.f32 %v425_v12, %v426_v13  ;;  %v430_v20 = vrot.slane %v412_v11, 1  ;;  %v432_v21 = vrot.slane %v412_v11, 2  ;;  %v448_v22 = vsel %vm447_vm8, %v409_v3, %v412_v11 }
 0x116   :  { %v435_v23 = vrot.slane %v419_v15, 3  ;;  %v438_v24 = vrot.slane %v421_v16, 4  ;;  %v440_v25 = vrot.slane %v421_v16, 5  ;;  %v489_v29 = vmax.f32 %v483_v9, %v487_v14 }
 0x117   :  { %v445_v27 = vrot.slane %v428_v19, 7  ;;  %v450_v28 = vsel %vm449_vm9, %v448_v22, %v430_v20  ;;  %v496_v30 = vmax.f32 %v483_v9, %v494_v18  ;;  %v497_v32 = vrot.slane %v484_v10, 2 }
 0x118   :  { %v452_v31 = vsel %vm451_vm13, %v450_v28, %v432_v21  ;;  %v500_v33 = vmax.f32 %v484_v10, %v494_v18  ;;  %v503_v34 = vrot.slane %v485_v17, 1  ;;  %v442_v35 = vrot.slane %v421_v16, 6 }
 0x119   :  { %v454_v36 = vsel %vm453_vm14, %v452_v31, %v435_v23  ;;  %461 = vst.msk [vmem:[%s784_s5 + $0x8] sm:$0x1] %vm460_vm15, %v445_v27  ;;  %v492_v37 = vmax.f32 %v489_v29, %v490_v26  ;;  %v506_v38 = vrot.slane %v485_v17, 2  ;;  %v499_v40 = vmax.f32 %v496_v30, %v497_v32 }
 0x11a   :  { %v456_v39 = vsel %vm455_vm5, %v454_v36, %v438_v24  ;;  %v501_v41 = vmax.f32 %v500_v33, %v497_v32  ;;  %v505_v48 = vmax.f32 %v484_v10, %v503_v34 }
 0x11b   :  { %v457_v49 = vsel %vm127_vm2, %v456_v39, %v440_v25  ;;  %v510_v50 = vrot.slane %v492_v37, 1  ;;  %v512_v42 = vrot.slane %v492_v37, 2  ;;  %v527_v43 = vsel %vm447_vm8, %v489_v29, %v492_v37 }
 0x11c   :  { %v458_v44 = vsel %vm51_vm0, %v457_v49, %v442_v35  ;;  %v508_v45 = vmax.f32 %v505_v48, %v506_v38  ;;  %v515_v46 = vrot.slane %v499_v40, 3  ;;  %v518_v51 = vrot.slane %v501_v41, 4 }
 0x11d   :  { %459 = vst.msk [vmem:[%s784_s5] sm:$0xff] %vm57_vm1, %v458_v44  ;;  %v528_v47 = vsel %vm449_vm9, %v527_v43, %v510_v50  ;;  %v520_v54 = vrot.slane %v501_v41, 5  ;;  %v522_v56 = vrot.slane %v501_v41, 6 }
 0x11e   :  { %v525_v52 = vrot.slane %v508_v45, 7  ;;  %v529_v53 = vsel %vm451_vm13, %v528_v47, %v512_v42 }
 0x11f   :  { %v530_v55 = vsel %vm453_vm14, %v529_v53, %v515_v46 }
 0x120   :  { %v531_v57 = vsel %vm455_vm5, %v530_v55, %v518_v51  ;;  %570 = vst.msk [vmem:[%s784_s5 + $0x18] sm:$0x1] %vm460_vm15, %v525_v52 }
 0x121   :  { %v532_v58 = vsel %vm127_vm2, %v531_v57, %v520_v54 }
 0x122   :  { %v533_v59 = vsel %vm51_vm0, %v532_v58, %v522_v56 }
 0x123   :  { %569 = vst.msk [vmem:[%s784_s5 + $0x10] sm:$0xff] %vm57_vm1, %v533_v59 }
 0x124   :  { %541 = vsyncpa [#allocation3], 1 }

</bundles_post_ra>
